<compile_context>
chip_gen: v5e
topology: v5e:2x2
jax: 0.10.0
libtpu: 0.0.40
codegen_flags: <defaults>
</compile_context>

<pallas_src>
import jax
import jax.numpy as jnp
import numpy as np
from jax.experimental import pallas as pl
from jax.experimental.pallas import tpu as pltpu

NUM_CLASSES = 21
LANES = 128            # lane-dense (padded) class axis


def _round_up(n, m):
    return ((n + m - 1) // m) * m


def predictor_svd_kernel(x_ref, w_ref, o_ref):
    """One grid step handles a (tile_n, D) slab of x.

    x_ref : (tile_n, D)    input features (compute dtype, e.g. bf16)
    w_ref : (D, 128)       classifier^T with 1/T folded in, zero-padded cols
    o_ref : (tile_n, 128)  softmax probabilities (pad columns are exactly 0)
    """
    # logits = x @ classifier.T / T   (1/T already folded into w)
    logits = jnp.dot(x_ref[...], w_ref[...],
                     preferred_element_type=jnp.float32)          # (tile_n, 128)

    # Mask the padded classes so they never win the max nor enter the sum.
    col = jax.lax.broadcasted_iota(jnp.int32, logits.shape, 1)
    logits = jnp.where(col < NUM_CLASSES, logits, jnp.float32(-1e30))

    # Numerically-stable softmax over the class axis (matches F.softmax dim=-1).
    m = jnp.max(logits, axis=-1, keepdims=True)
    e = jnp.exp(logits - m)
    denom = jnp.sum(e, axis=-1, keepdims=True)
    o_ref[...] = e * pl.reciprocal(denom, approx=True)


def build_classifier_T(U, s, scale, Vt21, T, compute_dtype):
    """Grid-invariant work hoisted out of the kernel.

    Returns classifier^T of shape (D, 128): U @ (diag(s*scale) @ V.T[:21,:]),
    transposed, with 1/T folded in and zero-padded to 128 lane-dense classes.
    """
    s_rescale = s.astype(jnp.float32) * scale.astype(jnp.float32)          # (21,)
    classifier = jnp.dot(U.astype(jnp.float32),
                         s_rescale[:, None] * Vt21.astype(jnp.float32),
                         precision=jax.lax.Precision.HIGHEST)              # (21, D)
    w = classifier.T * jnp.float32(1.0 / T)                                # (D, 21)
    w = jnp.pad(w, ((0, 0), (0, LANES - NUM_CLASSES)))                     # (D, 128)
    return w.astype(compute_dtype)


def predictor_svd_forward(x, U, s, scale, Vt21, T=0.01, tile_n=512,
                          compute_dtype=jnp.bfloat16):
    N, D = x.shape

    # Classifier is built once (not per grid step) and stays VMEM-resident.
    w = build_classifier_T(U, s, scale, Vt21, T, compute_dtype)

    # Tile selection + tail handling: pad the batch to a multiple of the tile.
    tile = max(8, min(int(tile_n), _round_up(N, 8)))
    tile = _round_up(tile, 8)
    n_pad = _round_up(N, tile)

    x_c = x.astype(compute_dtype)
    if n_pad != N:
        x_c = jnp.pad(x_c, ((0, n_pad - N), (0, 0)))

    # Explicit VMEM budget: double-buffered x + output tiles, resident w.
    itemsize = jnp.dtype(compute_dtype).itemsize
    est = (2 * tile * D * itemsize          # x tiles (double-buffered)
           + 2 * tile * LANES * 4           # output tiles (double-buffered, f32)
           + 2 * D * LANES * itemsize)      # classifier^T
    vmem_limit = int(min(max(4 * est, 32 * 1024 * 1024), 64 * 1024 * 1024))

    out = pl.pallas_call(
        predictor_svd_kernel,
        out_shape=jax.ShapeDtypeStruct((n_pad, LANES), jnp.float32),
        grid=(n_pad // tile,),
        in_specs=[
            pl.BlockSpec((tile, D), lambda i: (i, 0)),      # x tile: streamed
            pl.BlockSpec((D, LANES), lambda i: (0, 0)),     # classifier^T: resident
        ],
        out_specs=pl.BlockSpec((tile, LANES), lambda i: (i, 0)),
        compiler_params=pltpu.CompilerParams(
            dimension_semantics=("parallel",),
            vmem_limit_bytes=vmem_limit),
    )(x_c, w)

    return out[:N, :NUM_CLASSES]


def set_svd(centers, sharp_factor=1.0, base_value=1.0):
    """Equivalent of predictor_svd.set_SVD (one-time parameter setup, plain JAX)."""
    # torch.svd(A, some=False): A = U diag(S) V^T ; jnp returns Vh = V^T.
    U, S, Vh = jnp.linalg.svd(centers, full_matrices=True)
    s = base_value * jnp.abs(S / base_value) ** sharp_factor
    s = jnp.sign(S) * s
    Vt21 = Vh[:NUM_CLASSES, :]          # == V.t()[:21, :]
    return U, s, Vt21


if __name__ == "__main__":
    key = jax.random.PRNGKey(0)
    k_centers, k_x = jax.random.split(key)

    D = 128      # feature dim of x / centers
    N = 200      # deliberately NOT a multiple of the tile -> exercises padding

    centers = jax.random.normal(k_centers, (NUM_CLASSES, D), dtype=jnp.float32)
    x = jax.random.normal(k_x, (N, D), dtype=jnp.float32)

    # Deterministic parameter init, matching __init__: scale = ones((21,))
    scale = jnp.ones((NUM_CLASSES,), dtype=jnp.float32)

    U, s, Vt21 = set_svd(centers, sharp_factor=1.0, base_value=1.0)
    T = 0.01

    # --- f32 path: validates the forward semantics against the PyTorch formula.
    #     tile_n=64 forces a multi-step grid + a padded tail tile.
    out_f32 = jax.block_until_ready(
        predictor_svd_forward(x, U, s, scale, Vt21, T=T, tile_n=64,
                              compute_dtype=jnp.float32))
    classifier = jnp.dot(U, (s * scale)[:, None] * Vt21,
                         precision=jax.lax.Precision.HIGHEST)
    logits_ref = jnp.dot(x, classifier.T,
                         precision=jax.lax.Precision.HIGHEST) / T
    ref_f32 = jax.nn.softmax(logits_ref, axis=-1)
    assert out_f32.shape == (N, NUM_CLASSES)
    assert np.allclose(np.asarray(out_f32), np.asarray(ref_f32),
                       atol=2e-2, rtol=2e-2)

    # --- bf16 path (default perf config): compare against a same-precision
    #     reference (identical bf16-cast weights, f32-accumulating dot).
    out_bf16 = jax.block_until_ready(
        predictor_svd_forward(x, U, s, scale, Vt21, T=T,
                              compute_dtype=jnp.bfloat16))
    w_bf = build_classifier_T(U, s, scale, Vt21, T,
                              jnp.bfloat16)[:, :NUM_CLASSES]       # (D, 21)
    logits_bf = jnp.dot(x.astype(jnp.bfloat16), w_bf,
                        preferred_element_type=jnp.float32)
    ref_bf16 = jax.nn.softmax(logits_bf, axis=-1)
    assert out_bf16.shape == (N, NUM_CLASSES)
    assert np.allclose(np.asarray(out_bf16), np.asarray(ref_bf16),
                       atol=2e-2, rtol=2e-2)

    print("KERNEL_OK")
</pallas_src>

<mosaic_0001>
module attributes {stable_mosaic.version = 11 : i64} {
  func.func @predictor_svd_kernel(%arg0: i32, %arg1: memref<64x128xf32, #tpu.memory_space<vmem>>, %arg2: memref<128x128xf32, #tpu.memory_space<vmem>>, %arg3: memref<64x128xf32, #tpu.memory_space<vmem>>) attributes {dimension_semantics = [#tpu.dimension_semantics<parallel>], iteration_bounds = array<i64: 4>, scalar_prefetch = 0 : i64, scratch_operands = 0 : i64, tpu.core_type = #tpu.core_type<tc>, window_params = [{transform_indices = @transform_0, window_bounds = array<i64: 64, 128>}, {pipeline_mode = #tpu.pipeline_mode<synchronous>, transform_indices = @transform_1, window_bounds = array<i64: 128, 128>}, {transform_indices = @transform_2, window_bounds = array<i64: 64, 128>}]} {
    %c0 = arith.constant 0 : index
    %c0_0 = arith.constant 0 : index
    %0 = vector.load %arg1[%c0, %c0_0] : memref<64x128xf32, #tpu.memory_space<vmem>>, vector<64x128xf32>
    %c0_1 = arith.constant 0 : index
    %c0_2 = arith.constant 0 : index
    %1 = vector.load %arg2[%c0_1, %c0_2] : memref<128x128xf32, #tpu.memory_space<vmem>>, vector<128x128xf32>
    %cst = arith.constant dense<0.000000e+00> : vector<64x128xf32>
    %2 = tpu.matmul %0, %1, %cst {dimension_numbers = #tpu.dot_dimension_numbers<[1], [0], [0], [1], [0, 0, 1, 1], [], []>} : vector<64x128xf32>, vector<128x128xf32>, vector<64x128xf32> -> vector<64x128xf32>
    %3 = tpu.iota {dimensions = array<i32: 1>} : vector<64x128xi32>
    %c21_i32 = arith.constant 21 : i32
    %4 = vector.broadcast %c21_i32 : i32 to vector<64x128xi32>
    %5 = arith.cmpi slt, %3, %4 : vector<64x128xi32>
    %cst_3 = arith.constant -1.000000e+30 : f32
    %6 = vector.broadcast %cst_3 : f32 to vector<64x128xf32>
    %7 = arith.select %5, %2, %6 : vector<64x128xi1>, vector<64x128xf32>
    %cst_4 = arith.constant dense<0xFF800000> : vector<64xf32>
    %8 = vector.multi_reduction <maximumf>, %7, %cst_4 [1] : vector<64x128xf32> to vector<64xf32>
    %9 = vector.shape_cast %8 : vector<64xf32> to vector<64x1xf32>
    %10 = vector.broadcast %9 : vector<64x1xf32> to vector<64x128xf32>
    %11 = arith.subf %7, %10 : vector<64x128xf32>
    %12 = math.exp %11 : vector<64x128xf32>
    %cst_5 = arith.constant dense<0.000000e+00> : vector<64xf32>
    %13 = vector.multi_reduction <add>, %12, %cst_5 [1] : vector<64x128xf32> to vector<64xf32>
    %14 = vector.shape_cast %13 : vector<64xf32> to vector<64x1xf32>
    %15 = tpu.reciprocal %14 {approx = true} : vector<64x1xf32> -> vector<64x1xf32>
    %16 = vector.broadcast %15 : vector<64x1xf32> to vector<64x128xf32>
    %17 = arith.mulf %12, %16 : vector<64x128xf32>
    %c0_6 = arith.constant 0 : index
    %c0_7 = arith.constant 0 : index
    %18 = vector.load %arg3[%c0_6, %c0_7] : memref<64x128xf32, #tpu.memory_space<vmem>>, vector<64x128xf32>
    tpu.vector_store %arg3[%c0_6, %c0_7], %17 {strides = array<i32>} : memref<64x128xf32, #tpu.memory_space<vmem>>, vector<64x128xf32>,
    return
  }
  func.func @transform_0(%arg0: i32) -> (i32, i32) {
    %c0_i32 = arith.constant 0 : i32
    %c0_i32_0 = arith.constant 0 : i32
    return %arg0, %c0_i32 : i32, i32
  }
  func.func @transform_1(%arg0: i32) -> (i32, i32) {
    %c0_i32 = arith.constant 0 : i32
    %c0_i32_0 = arith.constant 0 : i32
    %c0_i32_1 = arith.constant 0 : i32
    return %c0_i32, %c0_i32_0 : i32, i32
  }
  func.func @transform_2(%arg0: i32) -> (i32, i32) {
    %c0_i32 = arith.constant 0 : i32
    %c0_i32_0 = arith.constant 0 : i32
    return %arg0, %c0_i32 : i32, i32
  }
}

</mosaic_0001>

<bundles_post_ra>
// kernel: tpu_custom_call.1
= control target key start
LH: loop header
LB: loop body
LE: loop exit
PB: predicated region body
PF: predicated region fallthrough
CT: control target
= control target key end

     0   :  { %7 = vsyncpa [#allocation3], 0  ;;  %s924_s0 = inlined_call_operand.hbm [shape: f32[256,128], index: 0, kind: input, shape index: {}]   ;;  %s925_s1 = inlined_call_operand.hbm [shape: f32[128,128], index: 1, kind: input, shape index: {}]   ;;  %s926_s2 = inlined_call_operand.hbm [shape: f32[256,128], index: 2, kind: output, shape index: {}]  }
   0x1   :  { %9 = vsyncpa [#allocation3 + $0x1], 0 }
   0x2   :  { %10 = vsyncpa [#allocation6], 0 }
   0x3   :  { %11 = vsyncpa [#allocation4], 0 }
   0x4   :  { %13 = vsyncpa [#allocation4 + $0x1], 0  ;;  %s749_s9 = smov 0   ;;  %s751_s10 = smov 0  }
   0x5   :  { %s753_s11 = smov 0   ;;  %s755_s12 = smov 0  }
   0x6 LB: > { %s770_s13 = sadd.s32 4294967295, %s727_s12   ;;  %s438_s14 = sadd.s32 4294967294, %s727_s12   ;;  %s727_s12 = sphi %s755_s12, %s935_s12   ;;  %s723_s11 = sphi %s753_s11, %s934_s11   ;;  %s719_s10 = sphi %s751_s10, %s933_s10   ;;  %s715_s9 = sphi %s749_s9, %s932_s9  }
   0x7   : > { %p39_p0 = scmp.ne.s32.totalorder %s719_s10, %s715_s9  ;;  %p40_p1 = scmp.eq.s32.totalorder %s770_s13, 0 }
   0x8   : > { %p84_p2 = scmp.eq.s32.totalorder %s770_s13, 3  ;;  %p90_p3 = scmp.eq.s32.totalorder %s438_s14, 3 }
   0x9   : > { %p779_p4 = por %p40_p1, %p39_p0  ;;  %p439_p5 = scmp.ge.s32.totalorder %s727_s12, 1 }
   0xa   : > { %p784_p6 = por %p90_p3, %p39_p0  ;;  %p97_p7 = scmp.lt.s32.totalorder %s727_s12, 5 }
   0xb   : > { %s108_s19 = sshll.u32 %s925_s1, 4  ;;  %s729_s21 = smov [#allocation5]   ;;  %s109_s19 = int_to_ptr.hbm [resolvable:$true] %s108_s19 }
   0xc   : > { %p792_p8 = pnand %p439_p5, %p97_p7  ;;  %s110_s22 = sshll.u32 %s729_s21, 4  ;;  %s111_s22 = int_to_ptr.vmem [resolvable:$true] %s110_s22 }
   0xd   : > { %s801_s23 = sadd.s32 1, %s727_s12   ;;  %s730_s24 = smov 128  }
   0xe   : > { %p512_p9 = pneg %p792_p8  ;;  %s731_s25 = smov 8  }
   0xf   : > { %s23_s26 = ssub.s32 %s727_s12, %s801_s23  ;;  %s26_s27 = sadd.s32 1, %s723_s11 }
  0x10   : > { %p513_p10 = pnand %p512_p9, %p40_p1  ;;  %p24_p11 = scmp.eq.s32.totalorder %s23_s26, 0 }
  0x11   : > { %p33_p12 = scmp.ne.s32.totalorder %s723_s11, %s719_s10  ;;  %p34_p13 = scmp.eq.s32.totalorder %s727_s12, 0 }
  0x12   : > { %515 = dma.hbm_to_vmem [thread:$0]  (!%p513_p10), %s109_s19, 2048, %s111_s22, [#allocation6], %s730_s24, %s730_s24, %s731_s25  }
  0x13   : > { %s813_s28 = scalar_select %p24_p11, %s723_s11, %s26_s27  }
  0x14   : > { %p817_p0 = por %p84_p2, %p33_p12  ;;  %p525_p3 = scmp.lt.s32.totalorder %s727_s12, 4 }
  0x15   : > { %s124_s30 = sand.u32 1, %s723_s11   ;;  %s454_s3 = sshll.u32 %s727_s12, 6 }
  0x16   : > { %p35_p5 = por %p34_p13, %p33_p12  ;;  %s442_s4 = sshll.u32 %s124_s30, 6 }
  0x17   : > { %s133_s7 = scalar_lea.hbm %s924_s0, %s454_s3  ;;  %s128_s14 = scalar_lea.vmem [#allocation2], %s442_s4 }
  0x18   : > { %s134_s8 = sshll.u32 %s133_s7, 4  ;;  %s136_s17 = sshll.u32 %s128_s14, 4  ;;  %s135_s8 = int_to_ptr.hbm [resolvable:$true] %s134_s8  ;;  %s137_s17 = int_to_ptr.vmem [resolvable:$true] %s136_s17 }
  0x19   : > { %p827_p7 = pnand %p525_p3, %p35_p5  ;;  %s125_s19 = scalar_lea.sflag [#allocation3], %s124_s30 }
  0x1a   : > { %s627_s21 = sshra.s32 %s135_s8, 4  ;;  %s634_s3 = scalar_lea.hbm %s924_s0, 256  ;;  %s628_s21 = int_to_ptr.hbm [resolvable:$true] %s627_s21 }
  0x1b   : > { %s629_s22 = scalar_lea.hbm %s628_s21, 64  ;;  %p631_p9 = pneg %p827_p7 }
  0x1c   : > { %p630_p2 = scmp.ne.s32.totalorder %s628_s21, %s629_s22  ;;  %p635_p12 = scmp.lt.s32.totalorder %s628_s21, %s924_s0 }
  0x1d   : > { %p636_p13 = scmp.lt.s32.totalorder %s634_s3, %s629_s22 }
  0x1e   : > { %p632_p10 = pnand %p631_p9, %p630_p2 }
  0x1f   : > { %p637_p3 = por %p636_p13, %p635_p12 }
  0x20   : > { %p633_p11 = pneg %p632_p10 }
  0x22   : > { %p638_p5 = pnand %p637_p3, %p633_p11 }
  0x24   : > { %641 = shalt.err (!%p638_p5)
}
  0x25   : > { %519 = dma.hbm_to_vmem [thread:$0]  (!%p827_p7), %s135_s8, 1024, %s137_s17, %s125_s19, %s730_s24, %s730_s24, %s731_s25  }
  0x26   : > { %148 = sbr.rel (%p792_p8) target bundleno = 484 (0x1e4), region = 28  ;;  %s847_s30 = sand.u32 (!%p792_p8), 1, %s719_s10  }
  0x27   : > { %s446_s6 = sshll.u32 (!%p792_p8), %s847_s30, 6  ;;  %s151_s7 = scalar_lea.sflag (!%p792_p8), [#allocation3], %s847_s30 }
  0x28   : > { %s853_s14 = scalar_lea.vmem (!%p792_p8), [#allocation2], %s446_s6 }
  0x2b   : > { %702 = dma.done.wait (%p779_p4), %s151_s7, 1024  }
  0x2c   : > { %704 = vsyncadd (%p779_p4), %s151_s7, 4294966272 }
  0x2d   : > { %706 = dma.done.wait (%p40_p1), [#allocation6], 2048  }
  0x2e   : > { %708 = vsyncadd (%p40_p1), [#allocation6], 4294965248  ;;  %v206_v0 = vld [vmem:[#allocation5 + $0x78] sm:$0xff]  ;;  %v205_v1 = vld [vmem:[#allocation5 + $0x70] sm:$0xff]  ;;  %v248_v24 = vlaneseq  ;;  %s881_s15 = scalar_lea.vmem [#allocation7], %s446_s6  ;;  %s455_s20 = sshll.u32 %s770_s13, 6 }
  0x2f   : > { %207 = vmatpush.msra.mxu0 %v206_v0  ;;  %456 = vmatpush.msra.mxu1 %v206_v0  ;;  %v204_v2 = vld [vmem:[#allocation5 + $0x68] sm:$0xff]  ;;  %v203_v3 = vld [vmem:[#allocation5 + $0x60] sm:$0xff]  ;;  %v202_v4 = vld [vmem:[#allocation5 + $0x58] sm:$0xff]  ;;  %s351_s8 = scalar_lea.hbm %s926_s2, %s455_s20  ;;  %s352_s17 = sshll.u32 %s881_s15, 4  ;;  %s353_s17 = int_to_ptr.vmem [resolvable:$true] %s352_s17 }
  0x30   : > { %457 = vmatpush.msra.mxu2 %v206_v0  ;;  %458 = vmatpush.msra.mxu3 %v206_v0  ;;  %v201_v5 = vld [vmem:[#allocation5 + $0x50] sm:$0xff]  ;;  %v200_v6 = vld [vmem:[#allocation5 + $0x48] sm:$0xff]  ;;  %v199_v7 = vld [vmem:[#allocation5 + $0x40] sm:$0xff]  ;;  %v249_v25 = vand.u32 127, %v248_v24  ;;  %s354_s13 = sshll.u32 %s351_s8, 4  ;;  %s340_s18 = scalar_lea.sflag [#allocation4], %s847_s30  ;;  %s355_s13 = int_to_ptr.hbm [resolvable:$true] %s354_s13 }
  0x31   : > { %208 = vmatpush.msra.mxu0 %v205_v1  ;;  %459 = vmatpush.msra.mxu1 %v205_v1  ;;  %v198_v8 = vld [vmem:[#allocation5 + $0x38] sm:$0xff]  ;;  %v197_v9 = vld [vmem:[#allocation5 + $0x30] sm:$0xff]  ;;  %v196_v10 = vld [vmem:[#allocation5 + $0x28] sm:$0xff]  ;;  %s671_s19 = sshra.s32 %s355_s13, 4  ;;  %s677_s27 = scalar_lea.hbm %s926_s2, 256  ;;  %s672_s19 = int_to_ptr.hbm [resolvable:$true] %s671_s19 }
  0x32   : > { %460 = vmatpush.msra.mxu2 %v205_v1  ;;  %461 = vmatpush.msra.mxu3 %v205_v1  ;;  %v195_v11 = vld [vmem:[#allocation5 + $0x20] sm:$0xff]  ;;  %v194_v12 = vld [vmem:[#allocation5 + $0x18] sm:$0xff]  ;;  %v193_v13 = vld [vmem:[#allocation5 + $0x10] sm:$0xff]  ;;  %vm250_vm0 = vcmp.lt.s32.totalorder %v249_v25, 21  ;;  %s673_s21 = scalar_lea.hbm %s672_s19, 64  ;;  %p678_p7 = scmp.lt.s32.totalorder %s672_s19, %s926_s2 }
  0x33   : > { %209 = vmatpush.msra.mxu0 %v204_v2  ;;  %462 = vmatpush.msra.mxu1 %v204_v2  ;;  %v192_v14 = vld [vmem:[#allocation5 + $0x8] sm:$0xff]  ;;  %v191_v15 = vld [vmem:[#allocation5] sm:$0xff]  ;;  %v185_v17 = vld [vmem:[%s853_s14 + $0x10] sm:$0xff]  ;;  %p674_p1 = scmp.ne.s32.totalorder %s672_s19, %s673_s21  ;;  %p679_p2 = scmp.lt.s32.totalorder %s677_s27, %s673_s21 }
  0x34   : > { %463 = vmatpush.msra.mxu2 %v204_v2  ;;  %464 = vmatpush.msra.mxu3 %v204_v2  ;;  %v183_v16 = vld [vmem:[%s853_s14] sm:$0xff]  ;;  %v189_v19 = vld [vmem:[%s853_s14 + $0x30] sm:$0xff]  ;;  %v184_v20 = vld [vmem:[%s853_s14 + $0x8] sm:$0xff] }
  0x35   : > { %210 = vmatpush.msra.mxu0 %v203_v3  ;;  %465 = vmatpush.msra.mxu1 %v203_v3  ;;  %v187_v18 = vld [vmem:[%s853_s14 + $0x20] sm:$0xff]  ;;  %v186_v21 = vld [vmem:[%s853_s14 + $0x18] sm:$0xff]  ;;  %v188_v22 = vld [vmem:[%s853_s14 + $0x28] sm:$0xff]  ;;  %p675_p4 = pnand %p674_p1, %p817_p0  ;;  %p680_p9 = por %p679_p2, %p678_p7 }
  0x36   : > { %466 = vmatpush.msra.mxu2 %v203_v3  ;;  %467 = vmatpush.msra.mxu3 %v203_v3  ;;  %v190_v23 = vld [vmem:[%s853_s14 + $0x38] sm:$0xff] }
  0x37   : > { %211 = vmatpush.msra.mxu0 %v202_v4  ;;  %468 = vmatpush.msra.mxu1 %v202_v4  ;;  %p676_p8 = pneg %p675_p4 }
  0x38   : > { %469 = vmatpush.msra.mxu2 %v202_v4  ;;  %470 = vmatpush.msra.mxu3 %v202_v4 }
  0x39   : > { %212 = vmatpush.msra.mxu0 %v201_v5  ;;  %471 = vmatpush.msra.mxu1 %v201_v5  ;;  %p681_p10 = pnand %p680_p9, %p676_p8 }
  0x3a   : > { %472 = vmatpush.msra.mxu2 %v201_v5  ;;  %473 = vmatpush.msra.mxu3 %v201_v5 }
  0x3b   : > { %213 = vmatpush.msra.mxu0 %v200_v6  ;;  %474 = vmatpush.msra.mxu1 %v200_v6 }
  0x3c   : > { %475 = vmatpush.msra.mxu2 %v200_v6  ;;  %476 = vmatpush.msra.mxu3 %v200_v6 }
  0x3d   : > { %214 = vmatpush.msra.mxu0 %v199_v7  ;;  %477 = vmatpush.msra.mxu1 %v199_v7 }
  0x3e   : > { %478 = vmatpush.msra.mxu2 %v199_v7  ;;  %479 = vmatpush.msra.mxu3 %v199_v7 }
  0x3f   : > { %215 = vmatpush.msra.mxu0 %v198_v8  ;;  %480 = vmatpush.msra.mxu1 %v198_v8 }
  0x40   : > { %481 = vmatpush.msra.mxu2 %v198_v8  ;;  %482 = vmatpush.msra.mxu3 %v198_v8 }
  0x41   : > { %216 = vmatpush.msra.mxu0 %v197_v9  ;;  %483 = vmatpush.msra.mxu1 %v197_v9 }
  0x42   : > { %484 = vmatpush.msra.mxu2 %v197_v9  ;;  %485 = vmatpush.msra.mxu3 %v197_v9 }
  0x43   : > { %217 = vmatpush.msra.mxu0 %v196_v10  ;;  %486 = vmatpush.msra.mxu1 %v196_v10 }
  0x44   : > { %487 = vmatpush.msra.mxu2 %v196_v10  ;;  %488 = vmatpush.msra.mxu3 %v196_v10 }
  0x45   : > { %218 = vmatpush.msra.mxu0 %v195_v11  ;;  %489 = vmatpush.msra.mxu1 %v195_v11 }
  0x46   : > { %490 = vmatpush.msra.mxu2 %v195_v11  ;;  %491 = vmatpush.msra.mxu3 %v195_v11 }
  0x47   : > { %219 = vmatpush.msra.mxu0 %v194_v12  ;;  %492 = vmatpush.msra.mxu1 %v194_v12 }
  0x48   : > { %493 = vmatpush.msra.mxu2 %v194_v12  ;;  %494 = vmatpush.msra.mxu3 %v194_v12 }
  0x49   : > { %220 = vmatpush.msra.mxu0 %v193_v13  ;;  %495 = vmatpush.msra.mxu1 %v193_v13 }
  0x4a   : > { %496 = vmatpush.msra.mxu2 %v193_v13  ;;  %497 = vmatpush.msra.mxu3 %v193_v13 }
  0x4b   : > { %221 = vmatpush.msra.mxu0 %v192_v14  ;;  %498 = vmatpush.msra.mxu1 %v192_v14 }
  0x4c   : > { %499 = vmatpush.msra.mxu2 %v192_v14  ;;  %500 = vmatpush.msra.mxu3 %v192_v14 }
  0x4d   : > { %222 = vmatpush.msra.mxu0 %v191_v15  ;;  %501 = vmatpush.msra.mxu1 %v191_v15 }
  0x4e   : > { %502 = vmatpush.msra.mxu2 %v191_v15  ;;  %223 = vmatmul.f32.vlgmr.msra.gmra.mxu0 %v183_v16 }
  0x4f   : > { %229 = vmatmul.f32.vlgmr.msra.gmra.mxu1 %v185_v17  ;;  %235 = vmatmul.f32.vlgmr.msra.gmra.mxu2 %v187_v18 }
  0x50   : > { %503 = vmatpush.msra.mxu3 %v191_v15 }
  0x51   : > { %241 = vmatmul.f32.vlgmr.msra.gmra.mxu3 %v189_v19 }
  0x56   : > { %226 = vmatmul.f32.gmra.mxu0 %v184_v20 }
  0x57   : > { %232 = vmatmul.f32.gmra.mxu1 %v186_v21  ;;  %238 = vmatmul.f32.gmra.mxu2 %v188_v22 }
  0x59   : > { %244 = vmatmul.f32.gmra.mxu3 %v190_v23 }
  0xcb   : > { %v224_v26 = vpop.f32.mrf.mxu0 }
  0xcc   : > { %v230_v27 = vpop.f32.mrf.mxu1  ;;  %v251_v28 = vsel %vm250_vm0, %v224_v26, -1e+30 }
  0xcd   : > { %v253_v29 = vsel %vm250_vm0, %v230_v27, -1e+30  ;;  %259 = vmax.xlane.f32.xlu0 %v251_v28 }
  0xce   : > { %263 = vmax.xlane.f32.xlu1 %v253_v29 }
  0xd2   : > { %v236_v30 = vpop.f32.mrf.mxu2 }
  0xd3   : > { %v255_v31 = vsel %vm250_vm0, %v236_v30, -1e+30  ;;  %v227_v32 = vpop.f32.mrf.mxu0 }
  0xd4   : > { %v242_v33 = vpop.f32.mrf.mxu3  ;;  %267 = vmax.xlane.f32.xlu2 %v255_v31  ;;  %v233_v34 = vpop.f32.mrf.mxu1  ;;  %v252_v35 = vsel %vm250_vm0, %v227_v32, -1e+30 }
  0xd5   : > { %v254_v36 = vsel %vm250_vm0, %v233_v34, -1e+30  ;;  %261 = vmax.xlane.f32.xlu0 %v252_v35  ;;  %v257_v40 = vsel %vm250_vm0, %v242_v33, -1e+30 }
  0xd6   : > { %265 = vmax.xlane.f32.xlu1 %v254_v36 }
  0xda   : > { %v239_v37 = vpop.f32.mrf.mxu2 }
  0xdb   : > { %v256_v38 = vsel %vm250_vm0, %v239_v37, -1e+30 }
  0xdc   : > { %v245_v39 = vpop.f32.mrf.mxu3  ;;  %269 = vmax.xlane.f32.xlu2 %v256_v38 }
  0xdd   : > { %v258_v41 = vsel %vm250_vm0, %v245_v39, -1e+30  ;;  %271 = vmax.xlane.f32.xlu0 %v257_v40 }
  0xde   : > { %273 = vmax.xlane.f32.xlu1 %v258_v41 }
 0x140   : > { %v260_v42 = vpop.xlane.xlu0 %259 }
 0x141   : > { %v264_v43 = vpop.xlane.xlu1 %263  ;;  %v275_v44 = vsub.f32 %v251_v28, %v260_v42 }
 0x142   : > { %v277_v45 = vsub.f32 %v253_v29, %v264_v43 }
 0x143   : > { %v283_v46 = vmul.f32 1.442695, %v275_v44 }
 0x144   : > { %v287_v47 = vmul.f32 1.442695, %v277_v45 }
 0x145   : > { %565 = vpow2.f32 %v283_v46 }
 0x146   : > { %567 = vpow2.f32 %v287_v47 }
 0x147   : > { %v268_v48 = vpop.xlane.xlu2 %267 }
 0x148   : > { %v279_v49 = vsub.f32 %v255_v31, %v268_v48  ;;  %v262_v50 = vpop.xlane.xlu0 %261 }
 0x149   : > { %v266_v51 = vpop.xlane.xlu1 %265  ;;  %v276_v55 = vsub.f32 %v252_v35, %v262_v50 }
 0x14a   : > { %v291_v52 = vmul.f32 1.442695, %v279_v49  ;;  %v278_v53 = vsub.f32 %v254_v36, %v266_v51 }
 0x14b   : > { %v566_v54 = vpop.eup %565  ;;  %v285_v58 = vmul.f32 1.442695, %v276_v55 }
 0x14c   : > { %v568_v56 = vpop.eup %567  ;;  %569 = vpow2.f32 %v291_v52  ;;  %v289_v57 = vmul.f32 1.442695, %v278_v53  ;;  %299 = vadd.xlane.f32.xlu2 %v566_v54 }
 0x14d   : > { %303 = vadd.xlane.f32.xlu1 %v568_v56 }
 0x14e   : > { %571 = vpow2.f32 %v289_v57 }
 0x14f   : > { %v270_v59 = vpop.xlane.xlu2 %269  ;;  %573 = vpow2.f32 %v285_v58 }
 0x150   : > { %v280_v60 = vsub.f32 %v256_v38, %v270_v59  ;;  %v272_v61 = vpop.xlane.xlu0 %271 }
 0x151   : > { %v274_v62 = vpop.xlane.xlu1 %273  ;;  %v281_v63 = vsub.f32 %v257_v40, %v272_v61 }
 0x152   : > { %v570_v0 = vpop.eup %569  ;;  %v293_v1 = vmul.f32 1.442695, %v280_v60  ;;  %v282_v4 = vsub.f32 %v258_v41, %v274_v62 }
 0x153   : > { %v295_v2 = vmul.f32 1.442695, %v281_v63  ;;  %307 = vadd.xlane.f32.xlu0 %v570_v0 }
 0x154   : > { %v572_v3 = vpop.eup %571  ;;  %575 = vpow2.f32 %v293_v1  ;;  %v297_v5 = vmul.f32 1.442695, %v282_v4 }
 0x155   : > { %577 = vpow2.f32 %v295_v2  ;;  %305 = vadd.xlane.f32.xlu2 %v572_v3  ;;  %v574_v6 = vpop.eup %573 }
 0x156   : > { %579 = vpow2.f32 %v297_v5 }
 0x15a   : > { %v576_v7 = vpop.eup %575 }
 0x15b   : > { %v578_v8 = vpop.eup %577  ;;  %309 = vadd.xlane.f32.xlu1 %v576_v7  ;;  %301 = vadd.xlane.f32.xlu0 %v574_v6 }
 0x15c   : > { %v580_v9 = vpop.eup %579 }
 0x15d   : > { %311 = vadd.xlane.f32.xlu2 %v578_v8 }
 0x163   : > { %313 = vadd.xlane.f32.xlu0 %v580_v9 }
 0x1bf   : > { %v300_v10 = vpop.xlane.xlu2 %299 }
 0x1c0   : > { %v304_v11 = vpop.xlane.xlu1 %303  ;;  %581 = vrcp.f32 %v300_v10 }
 0x1c1   : > { %583 = vrcp.f32 %v304_v11 }
 0x1c6   : > { %v582_v12 = vpop.eup %581  ;;  %v308_v13 = vpop.xlane.xlu0 %307 }
 0x1c7   : > { %v584_v14 = vpop.eup %583  ;;  %v323_v15 = vmul.f32 %v582_v12, %v566_v54  ;;  %585 = vrcp.f32 %v308_v13 }
 0x1c8   : > { %v325_v16 = vmul.f32 %v584_v14, %v568_v56  ;;  %v306_v17 = vpop.xlane.xlu2 %305 }
 0x1c9   : > { %331 = vst [vmem:[%s881_s15] sm:$0xff] %v323_v15  ;;  %587 = vrcp.f32 %v306_v17 }
 0x1ca   : > { %333 = vst [vmem:[%s881_s15 + $0x10] sm:$0xff] %v325_v16 }
 0x1cd   : > { %v586_v18 = vpop.eup %585 }
 0x1ce   : > { %v327_v19 = vmul.f32 %v586_v18, %v570_v0  ;;  %v310_v20 = vpop.xlane.xlu1 %309  ;;  %v302_v21 = vpop.xlane.xlu0 %301 }
 0x1cf   : > { %v588_v22 = vpop.eup %587  ;;  %589 = vrcp.f32 %v310_v20 }
 0x1d0   : > { %335 = vst [vmem:[%s881_s15 + $0x20] sm:$0xff] %v327_v19  ;;  %v326_v23 = vmul.f32 %v588_v22, %v572_v3  ;;  %591 = vrcp.f32 %v302_v21  ;;  %v312_v24 = vpop.xlane.xlu2 %311 }
 0x1d1   : > { %593 = vrcp.f32 %v312_v24 }
 0x1d2   : > { %334 = vst [vmem:[%s881_s15 + $0x18] sm:$0xff] %v326_v23 }
 0x1d5   : > { %v590_v25 = vpop.eup %589 }
 0x1d6   : > { %v592_v26 = vpop.eup %591  ;;  %v328_v27 = vmul.f32 %v590_v25, %v576_v7  ;;  %v314_v28 = vpop.xlane.xlu0 %313 }
 0x1d7   : > { %v594_v29 = vpop.eup %593  ;;  %v324_v30 = vmul.f32 %v592_v26, %v574_v6  ;;  %595 = vrcp.f32 %v314_v28 }
 0x1d8   : > { %336 = vst [vmem:[%s881_s15 + $0x28] sm:$0xff] %v328_v27  ;;  %v329_v31 = vmul.f32 %v594_v29, %v578_v8 }
 0x1d9   : > { %332 = vst [vmem:[%s881_s15 + $0x8] sm:$0xff] %v324_v30 }
 0x1da   : > { %337 = vst [vmem:[%s881_s15 + $0x30] sm:$0xff] %v329_v31 }
 0x1dd   : > { %v596_v32 = vpop.eup %595 }
 0x1de   : > { %v330_v33 = vmul.f32 %v596_v32, %v580_v9 }
 0x1e0   : > { %338 = vst [vmem:[%s881_s15 + $0x38] sm:$0xff] %v330_v33 }
 0x1e1   : > { %684 = shalt.err (!%p681_p10)
}
 0x1e2   : > { %s732_s5 = smov 128   ;;  %s733_s30 = smov 8  }
 0x1e3   : > { %510 = dma.vmem_to_hbm [thread:$0]  (%p817_p0), %s353_s17, 1024, %s355_s13, %s340_s18, %s732_s5, %s732_s5, %s733_s30  }
 0x1e4 PF: > { %p527_p11 = scmp.ge.s32.totalorder %s727_s12, 2  ;;  %s369_s6 = sand.u32 1, %s715_s9  }
 0x1e5   : > { %s370_s7 = scalar_lea.sflag [#allocation4], %s369_s6 }
 0x1e6   : > { %p521_p12 = pnand %p527_p11, %p784_p6 }
 0x1e8   : > { %p522_p13 = pneg %p521_p12 }
 0x1ea   : > { %710 = dma.done.wait (%p522_p13), %s370_s7, 1024  }
 0x1eb   : > { %712 = vsyncadd (%p522_p13), %s370_s7, 4294966272  ;;  %p16_p3 = scmp.ge.s32.totalorder %s801_s23, 6   ;;  %s932_s9 = smov %s719_s10 }
 0x1ec   : > { %s933_s10 = smov %s723_s11  ;;  %s934_s11 = smov %s813_s28 }
 0x1ed   : > { %s935_s12 = smov %s801_s23  ;;  %18 = sbr.rel (!%p16_p3) target bundleno = 6 (0x6), region = 77 }
 0x1f2   :  { %376 = vsyncpa [#allocation3], 1 }
 0x1f3   :  { %378 = vsyncpa [#allocation3 + $0x1], 1 }
 0x1f4   :  { %379 = vsyncpa [#allocation6], 1 }
 0x1f5   :  { %380 = vsyncpa [#allocation4], 1 }
 0x1f6   :  { %382 = vsyncpa [#allocation4 + $0x1], 1 }

</bundles_post_ra>
